<compile_context>
chip_gen: v5e
topology: v5e:2x2
jax: 0.10.0
libtpu: 0.0.40
codegen_flags: <defaults>
</compile_context>

<pallas_src>
import math

import jax
import jax.numpy as jnp
from jax import lax
from jax.experimental import pallas as pl
from jax.experimental.pallas import tpu as pltpu


def _round_up(x, m):
    return ((x + m - 1) // m) * m


def _tpu_vmem_capacity_bytes():
    """Physical VMEM per TensorCore, with a conservative (v7x-sized) fallback."""
    try:
        info = pltpu.get_tpu_info()
        cap = getattr(info, "vmem_capacity_bytes", None)
        if cap:
            return int(cap)
    except Exception:
        pass
    return 64 * 1024 * 1024


def _mxu_align():
    """256-aligned contraction/padding for v6e/v7x (2x256^2 MXU), 128 otherwise."""
    try:
        kind = jax.devices()[0].device_kind.lower()
    except Exception:
        return 128
    return 256 if ("v6" in kind or "7" in kind) else 128


def _pick_config(B, L, E, compute_dtype):
    """Pick (e_pad, tl_i, tl_j, vmem_limit) from the device generation."""
    itemsize = jnp.dtype(compute_dtype).itemsize
    align = _mxu_align()
    e_pad = _round_up(max(E, 128), align)
    l128 = _round_up(max(L, 128), 128)

    vmem_phys = _tpu_vmem_capacity_bytes()
    # ~2/3 of physical VMEM: ~85 MiB on 128-MiB v5e/v6e, ~43 MiB on 64-MiB v7x,
    # leaving headroom for Mosaic internal scratch.
    vmem_limit = max(32 << 20, min(int(vmem_phys * 0.68), 100 << 20))

    tl_j = min(256, l128)

    def vmem_need(ti, tj):
        zrow = 2 * ti * e_pad * itemsize        # double-buffered row tile
        zcol = 2 * tj * e_pad * itemsize        # double-buffered column stream
        wts = 1 * e_pad * e_pad * itemsize      # single-buffered (Buffered(1)) weight
        outb = 2 * ti * tj * 4                  # double-buffered output tile
        hscr = ti * e_pad * 4                   # f32 h scratch
        return zrow + zcol + wts + outb + hscr + e_pad * 4

    budget = int(vmem_limit * 0.85)
    cands = [t for t in (1024, 512, 256, 128) if t <= l128] or [128]
    tl_i = cands[-1]
    for t in cands:
        if vmem_need(t, tl_j) <= budget:
            tl_i = t
            break

    # v7x has two TensorCores sharding the (batch, row-tile) parallel axes;
    # with B == 1 keep at least 2 row tiles so both cores get work.
    if B == 1 and l128 >= 256:
        tl_i = min(tl_i, _round_up(l128 // 2, 128))

    return e_pad, tl_i, tl_j, vmem_limit


def _bilinear_contact_kernel(z_row_ref, z_col_ref, wt_ref, blin_ref, bias_ref,
                             out_ref, h_ref):
    # z_row_ref: (tl_i, E_pad)  row tile i of current batch element (compute dtype)
    # z_col_ref: (tl_j, E_pad)  column tile j of current batch element
    # wt_ref:    (E_pad, E_pad) W.T / sqrt(hidden_dim)      (compute dtype)
    # blin_ref:  (1, E_pad)     b_lin / sqrt(hidden_dim)    (f32)
    # bias_ref:  (1,)           scalar bias, SMEM           (f32)
    # out_ref:   (tl_i, tl_j)   f32
    # h_ref:     (tl_i, E_pad)  f32 VMEM scratch caching h' for the current row tile
    j = pl.program_id(2)

    # h' is valid across j only because j is the innermost, sequential
    # ("arbitrary") grid axis. Do not reorder the grid or mark j parallel.
    @pl.when(j == 0)
    def _():
        h = jnp.dot(z_row_ref[...], wt_ref[...],
                    preferred_element_type=jnp.float32)
        h_ref[...] = h + blin_ref[...]

    # s = h' @ z_col^T : contract the last dims directly (no in-kernel transpose).
    s = lax.dot_general(
        h_ref[...].astype(z_col_ref.dtype), z_col_ref[...],
        dimension_numbers=(((1,), (1,)), ((), ())),
        preferred_element_type=jnp.float32,
    )
    out_ref[...] = (s + bias_ref[0]).astype(out_ref.dtype)


def bilinear_contact_map(z, weight, lin_bias, bias, hidden_dim=1000,
                         *, compute_dtype=jnp.float32):
    """z: (B, L, E), weight: (E, E), lin_bias: (E,), bias: scalar -> (B, L, L)."""
    B, L, E = z.shape
    inv_scale = 1.0 / math.sqrt(hidden_dim)

    e_pad, tl_i, tl_j, vmem_limit = _pick_config(B, L, E, compute_dtype)
    l_pad_i = _round_up(max(L, tl_i), tl_i)
    l_pad_j = _round_up(max(L, tl_j), tl_j)
    n_i, n_j = l_pad_i // tl_i, l_pad_j // tl_j

    # Host-side parameter prep (once, amortized over all batches / tiles):
    # transpose W and fold 1/sqrt(hidden_dim) into W and b_lin.
    wt = jnp.asarray(weight, jnp.float32).T * inv_scale
    wt = jnp.pad(wt, ((0, e_pad - E), (0, e_pad - E))).astype(compute_dtype)
    blin = jnp.asarray(lin_bias, jnp.float32) * inv_scale
    blin = jnp.pad(blin, (0, e_pad - E)).reshape(1, e_pad)
    bias_arr = jnp.asarray(bias, jnp.float32).reshape(1)

    # Rows / columns padded independently to their own tile size; padded output
    # rows/cols are sliced off below (no-op when L is already tile-aligned).
    z_f32 = jnp.asarray(z, jnp.float32)
    z_row = jnp.pad(z_f32, ((0, 0), (0, l_pad_i - L), (0, e_pad - E))).astype(compute_dtype)
    z_col = jnp.pad(z_f32, ((0, 0), (0, l_pad_j - L), (0, e_pad - E))).astype(compute_dtype)

    itemsize = jnp.dtype(compute_dtype).itemsize
    cost = pl.CostEstimate(
        flops=2 * B * l_pad_i * e_pad * e_pad + 2 * B * l_pad_i * l_pad_j * e_pad,
        transcendentals=0,
        bytes_accessed=(B * l_pad_i * e_pad * itemsize           # z rows, read once
                        + B * n_i * l_pad_j * e_pad * itemsize   # z cols, once per row tile
                        + e_pad * e_pad * itemsize               # weight
                        + B * l_pad_i * l_pad_j * 4),            # output
    )

    def _build(use_buffer_hints):
        # Constant-index blocks (weight, linear bias) are never re-DMA'd, so a
        # single VMEM buffer suffices; reclaimed VMEM funds the larger row tile.
        const_kw = dict(pipeline_mode=pl.Buffered(1)) if use_buffer_hints else {}
        return pl.pallas_call(
            _bilinear_contact_kernel,
            out_shape=jax.ShapeDtypeStruct((B, l_pad_i, l_pad_j), jnp.float32),
            grid_spec=pltpu.PrefetchScalarGridSpec(
                num_scalar_prefetch=0,
                # j (column tiles) must stay innermost + sequential: the h
                # scratch is cached per (b, i) under pl.when(j == 0).
                grid=(B, n_i, n_j),
                in_specs=[
                    # z row tile (changes only with b, i -> not re-DMA'd over j)
                    pl.BlockSpec((pl.Squeezed(), tl_i, e_pad),
                                 lambda b, i, j: (b, i, 0)),
                    # z column tile (streams every j)
                    pl.BlockSpec((pl.Squeezed(), tl_j, e_pad),
                                 lambda b, i, j: (b, j, 0)),
                    # pre-transposed / pre-scaled weight (constant index)
                    pl.BlockSpec((e_pad, e_pad), lambda b, i, j: (0, 0),
                                 **const_kw),
                    # pre-scaled linear bias (constant index)
                    pl.BlockSpec((1, e_pad), lambda b, i, j: (0, 0),
                                 **const_kw),
                    # scalar bias in SMEM
                    pl.BlockSpec(memory_space=pltpu.MemorySpace.SMEM),
                ],
                out_specs=pl.BlockSpec((pl.Squeezed(), tl_i, tl_j),
                                       lambda b, i, j: (b, i, j)),
                scratch_shapes=[pltpu.VMEM((tl_i, e_pad), jnp.float32)],
            ),
            compiler_params=pltpu.CompilerParams(
                dimension_semantics=("parallel", "parallel", "arbitrary"),
                vmem_limit_bytes=int(vmem_limit),
            ),
            cost_estimate=cost,
        )

    try:
        out = _build(True)(z_row, z_col, wt, blin, bias_arr)
    except Exception:
        # Fallback: identical kernel without the single-buffering hints.
        out = _build(False)(z_row, z_col, wt, blin, bias_arr)

    return out[:, :L, :L]


def _reference(z, weight, lin_bias, bias, hidden_dim=1000):
    scale = math.sqrt(hidden_dim)
    h = jnp.einsum("ble,fe->blf", z, weight) + lin_bias[None, None, :]
    return jnp.einsum("blf,bmf->blm", h, z) / scale + bias


if __name__ == "__main__":
    key = jax.random.PRNGKey(0)
    k1, k2, k3 = jax.random.split(key, 3)

    B, L, E = 2, 8, 32  # batch, sequence length, embed_dim

    z = jax.random.normal(k1, (B, L, E), dtype=jnp.float32)

    # Deterministic synthetic parameters matching nn.Linear(E, E) shapes.
    bound = 1.0 / math.sqrt(E)
    weight = jax.random.uniform(k2, (E, E), minval=-bound, maxval=bound,
                                dtype=jnp.float32)
    lin_bias = jax.random.uniform(k3, (E,), minval=-bound, maxval=bound,
                                  dtype=jnp.float32)
    bias = jnp.zeros((), jnp.float32)  # nn.Parameter(torch.zeros(1))

    ref = _reference(z, weight, lin_bias, bias)

    # Exact (f32) path — matches PyTorch module semantics.
    out = jax.block_until_ready(bilinear_contact_map(z, weight, lin_bias, bias))
    assert out.shape == (B, L, L)
    assert jnp.allclose(out, ref, atol=1e-4, rtol=1e-4)

    # bf16-MXU path (f32 accumulation, f32 h scratch) — looser tolerance.
    out_bf16 = jax.block_until_ready(
        bilinear_contact_map(z, weight, lin_bias, bias,
                             compute_dtype=jnp.bfloat16))
    assert out_bf16.shape == (B, L, L)
    assert jnp.allclose(out_bf16, ref, atol=5e-2, rtol=5e-2)

    print("KERNEL_OK")
</pallas_src>

<mosaic_0001>
module attributes {stable_mosaic.version = 11 : i64} {
  func.func @_bilinear_contact_kernel(%arg0: i32, %arg1: i32, %arg2: i32, %arg3: memref<1x128x128xf32, #tpu.memory_space<vmem>>, %arg4: memref<1x128x128xf32, #tpu.memory_space<vmem>>, %arg5: memref<128x128xf32, #tpu.memory_space<vmem>>, %arg6: memref<1x128xf32, #tpu.memory_space<vmem>>, %arg7: memref<1xf32, #tpu.memory_space<smem>>, %arg8: memref<1x128x128xf32, #tpu.memory_space<vmem>>, %arg9: memref<128x128xf32, #tpu.memory_space<vmem>>) attributes {dimension_semantics = [#tpu.dimension_semantics<parallel>, #tpu.dimension_semantics<parallel>, #tpu.dimension_semantics<arbitrary>], iteration_bounds = array<i64: 2, 1, 1>, scalar_prefetch = 0 : i64, scratch_operands = 1 : i64, tpu.core_type = #tpu.core_type<tc>, window_params = [{transform_indices = @transform_0, window_bounds = array<i64: 1, 128, 128>}, {transform_indices = @transform_1, window_bounds = array<i64: 1, 128, 128>}, {pipeline_mode = #tpu.pipeline_mode<synchronous>, transform_indices = @transform_2, window_bounds = array<i64: 128, 128>}, {pipeline_mode = #tpu.pipeline_mode<synchronous>, transform_indices = @transform_3, window_bounds = array<i64: 1, 128>}, {transform_indices = @transform_4, window_bounds = array<i64: 1>}, {transform_indices = @transform_5, window_bounds = array<i64: 1, 128, 128>}]} {
    %c0_i32 = arith.constant 0 : i32
    %0 = arith.cmpi eq, %arg2, %c0_i32 : i32
    %1 = arith.extui %0 : i1 to i32
    %c0_i32_0 = arith.constant 0 : i32
    %2 = arith.cmpi ne, %1, %c0_i32_0 : i32
    scf.if %2 {
      %c0_9 = arith.constant 0 : index
      %c0_10 = arith.constant 0 : index
      %c0_11 = arith.constant 0 : index
      %13 = vector.load %arg3[%c0_9, %c0_10, %c0_11] : memref<1x128x128xf32, #tpu.memory_space<vmem>>, vector<1x128x128xf32>
      %14 = vector.shape_cast %13 : vector<1x128x128xf32> to vector<128x128xf32>
      %c0_12 = arith.constant 0 : index
      %c0_13 = arith.constant 0 : index
      %15 = vector.load %arg5[%c0_12, %c0_13] : memref<128x128xf32, #tpu.memory_space<vmem>>, vector<128x128xf32>
      %cst_14 = arith.constant dense<0.000000e+00> : vector<128x128xf32>
      %16 = tpu.matmul %14, %15, %cst_14 {dimension_numbers = #tpu.dot_dimension_numbers<[1], [0], [0], [1], [0, 0, 1, 1], [], []>} : vector<128x128xf32>, vector<128x128xf32>, vector<128x128xf32> -> vector<128x128xf32>
      %c0_15 = arith.constant 0 : index
      %c0_16 = arith.constant 0 : index
      %17 = vector.load %arg6[%c0_15, %c0_16] : memref<1x128xf32, #tpu.memory_space<vmem>>, vector<1x128xf32>
      %18 = vector.broadcast %17 : vector<1x128xf32> to vector<128x128xf32>
      %19 = arith.addf %16, %18 : vector<128x128xf32>
      %c0_17 = arith.constant 0 : index
      %c0_18 = arith.constant 0 : index
      %20 = vector.load %arg9[%c0_17, %c0_18] : memref<128x128xf32, #tpu.memory_space<vmem>>, vector<128x128xf32>
      tpu.vector_store %arg9[%c0_17, %c0_18], %19 {strides = array<i32>} : memref<128x128xf32, #tpu.memory_space<vmem>>, vector<128x128xf32>,
    } else {
    }
    %c0 = arith.constant 0 : index
    %c0_1 = arith.constant 0 : index
    %3 = vector.load %arg9[%c0, %c0_1] : memref<128x128xf32, #tpu.memory_space<vmem>>, vector<128x128xf32>
    %c0_2 = arith.constant 0 : index
    %c0_3 = arith.constant 0 : index
    %c0_4 = arith.constant 0 : index
    %4 = vector.load %arg4[%c0_2, %c0_3, %c0_4] : memref<1x128x128xf32, #tpu.memory_space<vmem>>, vector<1x128x128xf32>
    %5 = vector.shape_cast %4 : vector<1x128x128xf32> to vector<128x128xf32>
    %cst = arith.constant dense<0.000000e+00> : vector<128x128xf32>
    %6 = tpu.matmul %3, %5, %cst {dimension_numbers = #tpu.dot_dimension_numbers<[1], [1], [0], [0], [0, 0, 1, 0], [], []>} : vector<128x128xf32>, vector<128x128xf32>, vector<128x128xf32> -> vector<128x128xf32>
    %c0_5 = arith.constant 0 : index
    %7 = memref.load %arg7[%c0_5] : memref<1xf32, #tpu.memory_space<smem>>
    %8 = vector.broadcast %7 : f32 to vector<128x128xf32>
    %9 = arith.addf %6, %8 : vector<128x128xf32>
    %c0_6 = arith.constant 0 : index
    %c0_7 = arith.constant 0 : index
    %c0_8 = arith.constant 0 : index
    %10 = vector.load %arg8[%c0_6, %c0_7, %c0_8] : memref<1x128x128xf32, #tpu.memory_space<vmem>>, vector<1x128x128xf32>
    %11 = vector.shape_cast %10 : vector<1x128x128xf32> to vector<128x128xf32>
    %12 = vector.shape_cast %9 : vector<128x128xf32> to vector<1x128x128xf32>
    tpu.vector_store %arg8[%c0_6, %c0_7, %c0_8], %12 {strides = array<i32>} : memref<1x128x128xf32, #tpu.memory_space<vmem>>, vector<1x128x128xf32>,
    return
  }
  func.func @transform_0(%arg0: i32, %arg1: i32, %arg2: i32) -> (i32, i32, i32) {
    %c0_i32 = arith.constant 0 : i32
    %c0_i32_0 = arith.constant 0 : i32
    return %arg0, %arg1, %c0_i32 : i32, i32, i32
  }
  func.func @transform_1(%arg0: i32, %arg1: i32, %arg2: i32) -> (i32, i32, i32) {
    %c0_i32 = arith.constant 0 : i32
    %c0_i32_0 = arith.constant 0 : i32
    return %arg0, %arg2, %c0_i32 : i32, i32, i32
  }
  func.func @transform_2(%arg0: i32, %arg1: i32, %arg2: i32) -> (i32, i32) {
    %c0_i32 = arith.constant 0 : i32
    %c0_i32_0 = arith.constant 0 : i32
    %c0_i32_1 = arith.constant 0 : i32
    return %c0_i32, %c0_i32_0 : i32, i32
  }
  func.func @transform_3(%arg0: i32, %arg1: i32, %arg2: i32) -> (i32, i32) {
    %c0_i32 = arith.constant 0 : i32
    %c0_i32_0 = arith.constant 0 : i32
    %c0_i32_1 = arith.constant 0 : i32
    return %c0_i32, %c0_i32_0 : i32, i32
  }
  func.func @transform_4(%arg0: i32, %arg1: i32, %arg2: i32) -> i32 {
    %c0_i32 = arith.constant 0 : i32
    %c0_i32_0 = arith.constant 0 : i32
    return %c0_i32 : i32
  }
  func.func @transform_5(%arg0: i32, %arg1: i32, %arg2: i32) -> (i32, i32, i32) {
    %c0_i32 = arith.constant 0 : i32
    return %arg0, %arg1, %arg2 : i32, i32, i32
  }
}

module attributes {stable_mosaic.version = 11 : i64} {
  func.func @_bilinear_contact_kernel(%arg0: i32, %arg1: i32, %arg2: i32, %arg3: memref<1x128x128xf32, #tpu.memory_space<vmem>>, %arg4: memref<1x128x128xf32, #tpu.memory_space<vmem>>, %arg5: memref<128x128xf32, #tpu.memory_space<vmem>>, %arg6: memref<1x128xf32, #tpu.memory_space<vmem>>, %arg7: memref<1xf32, #tpu.memory_space<smem>>, %arg8: memref<1x128x128xf32, #tpu.memory_space<vmem>>, %arg9: memref<128x128xf32, #tpu.memory_space<vmem>>) attributes {dimension_semantics = [#tpu.dimension_semantics<parallel>, #tpu.dimension_semantics<parallel>, #tpu.dimension_semantics<arbitrary>], iteration_bounds = array<i64: 2, 1, 1>, scalar_prefetch = 0 : i64, scratch_operands = 1 : i64, tpu.core_type = #tpu.core_type<tc>, window_params = [{transform_indices = @transform_0, window_bounds = array<i64: 1, 128, 128>}, {transform_indices = @transform_1, window_bounds = array<i64: 1, 128, 128>}, {pipeline_mode = #tpu.pipeline_mode<synchronous>, transform_indices = @transform_2, window_bounds = array<i64: 128, 128>}, {pipeline_mode = #tpu.pipeline_mode<synchronous>, transform_indices = @transform_3, window_bounds = array<i64: 1, 128>}, {transform_indices = @transform_4, window_bounds = array<i64: 1>}, {transform_indices = @transform_5, window_bounds = array<i64: 1, 128, 128>}]} {
    %c0_i32 = arith.constant 0 : i32
    %0 = arith.cmpi eq, %arg2, %c0_i32 : i32
    %1 = arith.extui %0 : i1 to i32
    %c0_i32_0 = arith.constant 0 : i32
    %2 = arith.cmpi ne, %1, %c0_i32_0 : i32
    scf.if %2 {
      %c0_9 = arith.constant 0 : index
      %c0_10 = arith.constant 0 : index
      %c0_11 = arith.constant 0 : index
      %13 = vector.load %arg3[%c0_9, %c0_10, %c0_11] : memref<1x128x128xf32, #tpu.memory_space<vmem>>, vector<1x128x128xf32>
      %14 = vector.shape_cast %13 : vector<1x128x128xf32> to vector<128x128xf32>
      %c0_12 = arith.constant 0 : index
      %c0_13 = arith.constant 0 : index
      %15 = vector.load %arg5[%c0_12, %c0_13] : memref<128x128xf32, #tpu.memory_space<vmem>>, vector<128x128xf32>
      %cst_14 = arith.constant dense<0.000000e+00> : vector<128x128xf32>
      %16 = tpu.matmul %14, %15, %cst_14 {dimension_numbers = #tpu.dot_dimension_numbers<[1], [0], [0], [1], [0, 0, 1, 1], [], []>} : vector<128x128xf32>, vector<128x128xf32>, vector<128x128xf32> -> vector<128x128xf32>
      %c0_15 = arith.constant 0 : index
      %c0_16 = arith.constant 0 : index
      %17 = vector.load %arg6[%c0_15, %c0_16] : memref<1x128xf32, #tpu.memory_space<vmem>>, vector<1x128xf32>
      %18 = vector.broadcast %17 : vector<1x128xf32> to vector<128x128xf32>
      %19 = arith.addf %16, %18 : vector<128x128xf32>
      %c0_17 = arith.constant 0 : index
      %c0_18 = arith.constant 0 : index
      %20 = vector.load %arg9[%c0_17, %c0_18] : memref<128x128xf32, #tpu.memory_space<vmem>>, vector<128x128xf32>
      tpu.vector_store %arg9[%c0_17, %c0_18], %19 {strides = array<i32>} : memref<128x128xf32, #tpu.memory_space<vmem>>, vector<128x128xf32>,
    } else {
    }
    %c0 = arith.constant 0 : index
    %c0_1 = arith.constant 0 : index
    %3 = vector.load %arg9[%c0, %c0_1] : memref<128x128xf32, #tpu.memory_space<vmem>>, vector<128x128xf32>
    %c0_2 = arith.constant 0 : index
    %c0_3 = arith.constant 0 : index
    %c0_4 = arith.constant 0 : index
    %4 = vector.load %arg4[%c0_2, %c0_3, %c0_4] : memref<1x128x128xf32, #tpu.memory_space<vmem>>, vector<1x128x128xf32>
    %5 = vector.shape_cast %4 : vector<1x128x128xf32> to vector<128x128xf32>
    %cst = arith.constant dense<0.000000e+00> : vector<128x128xf32>
    %6 = tpu.matmul %3, %5, %cst {dimension_numbers = #tpu.dot_dimension_numbers<[1], [1], [0], [0], [0, 0, 1, 0], [], []>} : vector<128x128xf32>, vector<128x128xf32>, vector<128x128xf32> -> vector<128x128xf32>
    %c0_5 = arith.constant 0 : index
    %7 = memref.load %arg7[%c0_5] : memref<1xf32, #tpu.memory_space<smem>>
    %8 = vector.broadcast %7 : f32 to vector<128x128xf32>
    %9 = arith.addf %6, %8 : vector<128x128xf32>
    %c0_6 = arith.constant 0 : index
    %c0_7 = arith.constant 0 : index
    %c0_8 = arith.constant 0 : index
    %10 = vector.load %arg8[%c0_6, %c0_7, %c0_8] : memref<1x128x128xf32, #tpu.memory_space<vmem>>, vector<1x128x128xf32>
    %11 = vector.shape_cast %10 : vector<1x128x128xf32> to vector<128x128xf32>
    %12 = vector.shape_cast %9 : vector<128x128xf32> to vector<1x128x128xf32>
    tpu.vector_store %arg8[%c0_6, %c0_7, %c0_8], %12 {strides = array<i32>} : memref<1x128x128xf32, #tpu.memory_space<vmem>>, vector<1x128x128xf32>,
    return
  }
  func.func @transform_0(%arg0: i32, %arg1: i32, %arg2: i32) -> (i32, i32, i32) {
    %c0_i32 = arith.constant 0 : i32
    %c0_i32_0 = arith.constant 0 : i32
    return %arg0, %arg1, %c0_i32 : i32, i32, i32
  }
  func.func @transform_1(%arg0: i32, %arg1: i32, %arg2: i32) -> (i32, i32, i32) {
    %c0_i32 = arith.constant 0 : i32
    %c0_i32_0 = arith.constant 0 : i32
    return %arg0, %arg2, %c0_i32 : i32, i32, i32
  }
  func.func @transform_2(%arg0: i32, %arg1: i32, %arg2: i32) -> (i32, i32) {
    %c0_i32 = arith.constant 0 : i32
    %c0_i32_0 = arith.constant 0 : i32
    %c0_i32_1 = arith.constant 0 : i32
    return %c0_i32, %c0_i32_0 : i32, i32
  }
  func.func @transform_3(%arg0: i32, %arg1: i32, %arg2: i32) -> (i32, i32) {
    %c0_i32 = arith.constant 0 : i32
    %c0_i32_0 = arith.constant 0 : i32
    %c0_i32_1 = arith.constant 0 : i32
    return %c0_i32, %c0_i32_0 : i32, i32
  }
  func.func @transform_4(%arg0: i32, %arg1: i32, %arg2: i32) -> i32 {
    %c0_i32 = arith.constant 0 : i32
    %c0_i32_0 = arith.constant 0 : i32
    return %c0_i32 : i32
  }
  func.func @transform_5(%arg0: i32, %arg1: i32, %arg2: i32) -> (i32, i32, i32) {
    %c0_i32 = arith.constant 0 : i32
    return %arg0, %arg1, %arg2 : i32, i32, i32
  }
}

</mosaic_0001>

<bundles_post_ra>
// kernel: tpu_custom_call.1
= control target key start
LH: loop header
LB: loop body
LE: loop exit
PB: predicated region body
PF: predicated region fallthrough
CT: control target
= control target key end

     0   :  { %s1320_s0 = inlined_call_operand.hbm [shape: f32[2,128,128], index: 0, kind: input, shape index: {}]   ;;  %s1321_s1 = inlined_call_operand.hbm [shape: f32[2,128,128], index: 1, kind: input, shape index: {}]   ;;  %s1322_s2 = inlined_call_operand.hbm [shape: f32[128,128], index: 2, kind: input, shape index: {}]   ;;  %s1323_s3 = inlined_call_operand.vmem [shape: f32[1,128], index: 3, kind: input, shape index: {}]   ;;  %s1324_s4 = inlined_call_operand.<no memory space> [shape: f32[1], index: 4, kind: input, shape index: {}]   ;;  %s1325_s5 = inlined_call_operand.hbm [shape: f32[2,128,128], index: 5, kind: output, shape index: {}]  }
   0x1   :  { %1332 = sst [smem:[#allocation18_spill]] %s1322_s2 }
   0x2   :  { %10 = sst [smem:[#allocation3]] %s1324_s4 }
   0x3   :  { %11 = vsyncpa [#allocation5], 0 }
   0x4   :  { %13 = vsyncpa [#allocation5 + $0x1], 0 }
   0x5   :  { %14 = vsyncpa [#allocation8], 0 }
   0x6   :  { %16 = vsyncpa [#allocation8 + $0x1], 0 }
   0x7   :  { %17 = vsyncpa [#allocation6], 0 }
   0x8   :  { %19 = vsyncpa [#allocation6 + $0x1], 0  ;;  %s1094_s20 = smov 0   ;;  %s1096_s21 = smov 0  }
   0x9   :  { %s1098_s22 = smov 0   ;;  %s1100_s23 = smov 0  }
   0xa   :  { %s1102_s24 = smov 0   ;;  %s1104_s25 = smov 0  }
   0xb LB: > { %1333 = sst [smem:[#allocation15_spill]] %s1050_s24  ;;  %s1125_s4 = sadd.s32 4294967295, %s1054_s25   ;;  %s1054_s25 = sphi %s1104_s25, %s25_s25   ;;  %s1050_s24 = sphi %s1102_s24, %s1346_s24   ;;  %s1046_s23 = sphi %s1100_s23, %s1345_s23   ;;  %s1042_s22 = sphi %s1098_s22, %s1349_s22   ;;  %s1038_s21 = sphi %s1096_s21, %s1348_s21   ;;  %s1034_s20 = sphi %s1094_s20, %s1347_s20  }
   0xc   : > { %s720_s26 = sadd.s32 4294967294, %s1054_s25   ;;  %p66_p0 = scmp.ne.s32.totalorder %s1038_s21, %s1034_s20 }
   0xd   : > { %p67_p1 = scmp.eq.s32.totalorder %s1125_s4, 0  ;;  %p185_p2 = scmp.eq.s32.totalorder %s1125_s4, 1 }
   0xe   : > { %p191_p3 = scmp.eq.s32.totalorder %s720_s26, 1  ;;  %p721_p5 = scmp.ge.s32.totalorder %s1054_s25, 1 }
   0xf   : > { %p1134_p4 = por %p67_p1, %p66_p0  ;;  %p198_p7 = scmp.lt.s32.totalorder %s1054_s25, 3 }
  0x10   : > { %p1139_p6 = por %p191_p3, %p66_p0  ;;  %s1336_s2 = sld [smem:[#allocation18_spill]] }
  0x11   : > { %p1147_p8 = pnand %p721_p5, %p198_p7  ;;  %s1056_s8 = smov [#allocation9]  }
  0x12   : > { %s211_s9 = sshll.u32 %s1056_s8, 4  ;;  %p723_p11 = scmp.ge.s32.totalorder %s1054_s25, 2  ;;  %s212_s9 = int_to_ptr.vmem [resolvable:$true] %s211_s9 }
  0x13   : > { %p801_p9 = pneg %p1147_p8  ;;  %s1326_s10 = smov 128  }
  0x14   : > { %s1328_s11 = smov 8   ;;  %s44_s12 = sadd.s32 1, %s1050_s24 }
  0x15   : > { %p802_p10 = pnand %p801_p9, %p67_p1  ;;  %p46_p12 = scmp.ge.s32.totalorder %s44_s12, 2 }
  0x16   : > { %s209_s6 = sshll.u32 %s1336_s2, 4  ;;  %s53_s13 = sadd.s32 1, %s1042_s22  ;;  %s210_s6 = int_to_ptr.hbm [resolvable:$true] %s209_s6 }
  0x17   : > { %804 = dma.hbm_to_vmem [thread:$0]  (!%p802_p10), %s210_s6, 2048, %s212_s9, [#allocation8], %s1326_s10, %s1326_s10, %s1328_s11  }
  0x18   : > { %p60_p13 = scmp.ne.s32.totalorder %s1042_s22, %s1038_s21  ;;  %p61_p0 = scmp.eq.s32.totalorder %s1054_s25, 0 }
  0x19   : > { %s1351_s12 = smov (%p46_p12, %s44_s12), 0  ;;  %p817_p7 = scmp.lt.s32.totalorder %s1054_s25, 2 }
  0x1a   : > { %1338 = sst [smem:[#allocation16_spill]] %s1351_s12  ;;  %p1166_p3 = por %p61_p0, %p60_p13 }
  0x1b   : > { %p1172_p5 = por %p185_p2, %p60_p13  ;;  %s48_s16 = ssub.s32 %s1050_s24, %s1351_s12 }
  0x1c   : > { %p51_p9 = scmp.eq.s32.totalorder %s48_s16, 0  ;;  %s231_s17 = sand.u32 1, %s1042_s22  }
  0x1d   : > { %s724_s18 = sshll.u32 %s231_s17, 7  ;;  %s740_s26 = sshll.u32 %s1050_s24, 7 }
  0x1e   : > { %s1181_s19 = scalar_select %p51_p9, %s1042_s22, %s53_s13  }
  0x1f   : > { %s242_s6 = scalar_lea.hbm %s1320_s0, %s740_s26  ;;  %s235_s8 = scalar_lea.vmem [#allocation4], %s724_s18 }
  0x20   : > { %1341 = sst [smem:[#allocation17_spill]] %s1181_s19  ;;  %s245_s9 = sshll.u32 %s235_s8, 4  ;;  %s246_s9 = int_to_ptr.vmem [resolvable:$true] %s245_s9 }
  0x21   : > { %s243_s10 = sshll.u32 %s242_s6, 4  ;;  %p806_p2 = pnand %p817_p7, %p1166_p3  ;;  %s244_s10 = int_to_ptr.hbm [resolvable:$true] %s243_s10 }
  0x22   : > { %s266_s16 = scalar_lea.hbm %s1321_s1, %s740_s26  ;;  %s232_s13 = scalar_lea.sflag [#allocation5], %s231_s17 }
  0x23   : > { %s267_s12 = sshll.u32 %s266_s16, 4  ;;  %s1342_s19 = smov 8   ;;  %s268_s12 = int_to_ptr.hbm [resolvable:$true] %s267_s12 }
  0x24   : > { %s1343_s24 = smov 128   ;;  %s259_s29 = scalar_lea.vmem [#allocation7], %s724_s18 }
  0x25   : > { %808 = dma.hbm_to_vmem [thread:$0]  (!%p806_p2), %s244_s10, 2048, %s246_s9, %s232_s13, %s1343_s24, %s1343_s24, %s1342_s19  }
  0x26   : > { %s269_s30 = sshll.u32 %s259_s29, 4  ;;  %s255_s8 = sand.u32 1, %s1054_s25   ;;  %s270_s30 = int_to_ptr.vmem [resolvable:$true] %s269_s30 }
  0x27   : > { %s256_s6 = scalar_lea.sflag [#allocation8], %s255_s8  ;;  %281 = sbr.rel (%p1147_p8) target bundleno = 444 (0x1bc), region = 40 }
  0x28   : > { %811 = dma.hbm_to_vmem [thread:$0]  (!%p806_p2), %s268_s12, 2048, %s270_s30, %s256_s6, %s1343_s24, %s1343_s24, %s1342_s19  }
  0x29   : > { %s1202_s2 = sand.u32 (!%p1147_p8), 1, %s1038_s21  }
  0x2a   : > { %s1205_s10 = sshll.u32 (!%p1147_p8), %s1202_s2, 7  ;;  %s284_s11 = scalar_lea.sflag (!%p1147_p8), [#allocation5], %s1202_s2 }
  0x2b   : > { %s1209_s14 = scalar_lea.vmem (!%p1147_p8), [#allocation4], %s1205_s10 }
  0x2c   : > { %1017 = dma.done.wait (%p1134_p4), %s284_s11, 2048  }
  0x2d   : > { %1019 = vsyncadd (%p1134_p4), %s284_s11, 4294965248  ;;  %s293_s24 = sand.u32 1, %s1125_s4   ;;  %s1217_s12 = scalar_lea.vmem [#allocation7], %s1205_s10 }
  0x2e   : > { %s294_s7 = scalar_lea.sflag [#allocation8], %s293_s24 }
  0x2f   : > { %1021 = dma.done.wait (%p1134_p4), %s294_s7, 2048  }
  0x30   : > { %1023 = vsyncadd (%p1134_p4), %s294_s7, 4294965248 }
  0x31   : > { %1025 = dma.done.wait (%p67_p1), [#allocation8], 2048  }
  0x32   : > { %1027 = vsyncadd (%p67_p1), [#allocation8], 4294965248  ;;  %v373_v0 = vld [vmem:[#allocation9 + $0x78] sm:$0xff]  ;;  %v372_v1 = vld [vmem:[#allocation9 + $0x70] sm:$0xff]  ;;  %s491_s17 = sld [smem:[#allocation3]]  ;;  %s1263_s18 = scalar_lea.vmem [#allocation10], %s1205_s10 }
  0x33   : > { %378 = vmatpush.msra.mxu0 %v373_v0  ;;  %743 = vmatpush.msra.mxu3 %v373_v0  ;;  %v371_v2 = vld [vmem:[#allocation9 + $0x68] sm:$0xff]  ;;  %v370_v3 = vld [vmem:[#allocation9 + $0x60] sm:$0xff]  ;;  %v369_v4 = vld [vmem:[#allocation9 + $0x58] sm:$0xff]  ;;  %s742_s19 = sshll.u32 %s1046_s23, 7  ;;  %s590_s13 = sshll.u32 %s1263_s18, 4  ;;  %s591_s13 = int_to_ptr.vmem [resolvable:$true] %s590_s13 }
  0x34   : > { %v368_v5 = vld [vmem:[#allocation9 + $0x50] sm:$0xff]  ;;  %v367_v6 = vld [vmem:[#allocation9 + $0x48] sm:$0xff]  ;;  %v366_v7 = vld [vmem:[#allocation9 + $0x40] sm:$0xff]  ;;  %s589_s16 = scalar_lea.hbm %s1325_s5, %s742_s19  ;;  %s575_s30 = scalar_lea.sflag [#allocation6], %s1202_s2 }
  0x35   : > { %379 = vmatpush.msra.mxu0 %v372_v1  ;;  %744 = vmatpush.msra.mxu3 %v372_v1  ;;  %v365_v8 = vld [vmem:[#allocation9 + $0x38] sm:$0xff]  ;;  %v364_v9 = vld [vmem:[#allocation9 + $0x30] sm:$0xff]  ;;  %v363_v10 = vld [vmem:[#allocation9 + $0x28] sm:$0xff]  ;;  %s592_s29 = sshll.u32 %s589_s16, 4  ;;  %s984_s11 = scalar_lea.hbm %s1325_s5, 256  ;;  %s593_s29 = int_to_ptr.hbm [resolvable:$true] %s592_s29 }
  0x36   : > { %v362_v11 = vld [vmem:[#allocation9 + $0x20] sm:$0xff]  ;;  %v361_v12 = vld [vmem:[#allocation9 + $0x18] sm:$0xff]  ;;  %v360_v13 = vld [vmem:[#allocation9 + $0x10] sm:$0xff]  ;;  %s978_s8 = sshra.s32 %s593_s29, 4  ;;  %s979_s8 = int_to_ptr.hbm [resolvable:$true] %s978_s8 }
  0x37   : > { %380 = vmatpush.msra.mxu0 %v371_v2  ;;  %745 = vmatpush.msra.mxu3 %v371_v2  ;;  %v359_v14 = vld [vmem:[#allocation9 + $0x8] sm:$0xff]  ;;  %v358_v15 = vld [vmem:[#allocation9] sm:$0xff]  ;;  %v344_v18 = vld [vmem:[%s1209_s14 + $0x10] sm:$0xff]  ;;  %s980_s6 = scalar_lea.hbm %s979_s8, 128  ;;  %p985_p10 = scmp.lt.s32.totalorder %s979_s8, %s1325_s5 }
  0x38   : > { %v342_v16 = vld [vmem:[%s1209_s14] sm:$0xff]  ;;  %v343_v17 = vld [vmem:[%s1209_s14 + $0x8] sm:$0xff]  ;;  %v352_v19 = vld [vmem:[%s1209_s14 + $0x50] sm:$0xff]  ;;  %p981_p1 = scmp.ne.s32.totalorder %s979_s8, %s980_s6  ;;  %p986_p12 = scmp.lt.s32.totalorder %s984_s11, %s980_s6 }
  0x39   : > { %381 = vmatpush.msra.mxu0 %v370_v3  ;;  %746 = vmatpush.msra.mxu3 %v370_v3  ;;  %v345_v20 = vld [vmem:[%s1209_s14 + $0x18] sm:$0xff]  ;;  %v346_v22 = vld [vmem:[%s1209_s14 + $0x20] sm:$0xff]  ;;  %v489_v25 = vld [vmem:[%s1217_s12 + $0x70] sm:$0xff] }
  0x3a   : > { %v353_v21 = vld [vmem:[%s1209_s14 + $0x58] sm:$0xff]  ;;  %v354_v24 = vld [vmem:[%s1209_s14 + $0x60] sm:$0xff]  ;;  %v347_v26 = vld [vmem:[%s1209_s14 + $0x28] sm:$0xff]  ;;  %p982_p4 = pnand %p981_p1, %p1172_p5  ;;  %p987_p13 = por %p986_p12, %p985_p10 }
  0x3b   : > { %382 = vmatpush.msra.mxu0 %v369_v4  ;;  %747 = vmatpush.msra.mxu3 %v369_v4  ;;  %v490_v23 = vld [vmem:[%s1217_s12 + $0x78] sm:$0xff]  ;;  %v488_v27 = vld [vmem:[%s1217_s12 + $0x68] sm:$0xff]  ;;  %v487_v29 = vld [vmem:[%s1217_s12 + $0x60] sm:$0xff] }
  0x3c   : > { %493 = vmatpush.xpose.msra.mxu1 %v490_v23  ;;  %759 = vmatpush.xpose.msra.mxu2 %v490_v23  ;;  %v355_v28 = vld [vmem:[%s1209_s14 + $0x68] sm:$0xff]  ;;  %v348_v30 = vld [vmem:[%s1209_s14 + $0x30] sm:$0xff]  ;;  %v486_v31 = vld [vmem:[%s1217_s12 + $0x58] sm:$0xff]  ;;  %p983_p8 = pneg %p982_p4 }
  0x3d   : > { %383 = vmatpush.msra.mxu0 %v368_v5  ;;  %748 = vmatpush.msra.mxu3 %v368_v5  ;;  %v356_v32 = vld [vmem:[%s1209_s14 + $0x70] sm:$0xff]  ;;  %v349_v34 = vld [vmem:[%s1209_s14 + $0x38] sm:$0xff]  ;;  %v484_v35 = vld [vmem:[%s1217_s12 + $0x48] sm:$0xff] }
  0x3e   : > { %v485_v33 = vld [vmem:[%s1217_s12 + $0x50] sm:$0xff]  ;;  %v357_v36 = vld [vmem:[%s1209_s14 + $0x78] sm:$0xff]  ;;  %v483_v37 = vld [vmem:[%s1217_s12 + $0x40] sm:$0xff]  ;;  %p988_p0 = pnand %p987_p13, %p983_p8 }
  0x3f   : > { %384 = vmatpush.msra.mxu0 %v367_v6  ;;  %749 = vmatpush.msra.mxu3 %v367_v6  ;;  %v350_v38 = vld [vmem:[%s1209_s14 + $0x40] sm:$0xff]  ;;  %v482_v39 = vld [vmem:[%s1217_s12 + $0x38] sm:$0xff]  ;;  %v481_v40 = vld [vmem:[%s1217_s12 + $0x30] sm:$0xff] }
  0x40   : > { %494 = vmatpush.xpose.msra.mxu1 %v489_v25  ;;  %761 = vmatpush.xpose.msra.mxu2 %v489_v25  ;;  %v351_v41 = vld [vmem:[%s1209_s14 + $0x48] sm:$0xff]  ;;  %v479_v43 = vld [vmem:[%s1217_s12 + $0x20] sm:$0xff]  ;;  %v478_v44 = vld [vmem:[%s1217_s12 + $0x18] sm:$0xff] }
  0x41   : > { %385 = vmatpush.msra.mxu0 %v366_v7  ;;  %750 = vmatpush.msra.mxu3 %v366_v7  ;;  %v480_v42 = vld [vmem:[%s1217_s12 + $0x28] sm:$0xff]  ;;  %v477_v45 = vld [vmem:[%s1217_s12 + $0x10] sm:$0xff]  ;;  %v475_v47 = vld [vmem:[%s1217_s12] sm:$0xff] }
  0x42   : > { %v476_v46 = vld [vmem:[%s1217_s12 + $0x8] sm:$0xff]  ;;  %v873_v48 = vld [vmem:[%s1323_s3] ss:$0 sm:$0xff] }
  0x43   : > { %386 = vmatpush.msra.mxu0 %v365_v8  ;;  %751 = vmatpush.msra.mxu3 %v365_v8 }
  0x44   : > { %495 = vmatpush.xpose.msra.mxu1 %v488_v27  ;;  %763 = vmatpush.xpose.msra.mxu2 %v488_v27 }
  0x45   : > { %387 = vmatpush.msra.mxu0 %v364_v9  ;;  %752 = vmatpush.msra.mxu3 %v364_v9 }
  0x47   : > { %388 = vmatpush.msra.mxu0 %v363_v10  ;;  %753 = vmatpush.msra.mxu3 %v363_v10 }
  0x48   : > { %496 = vmatpush.xpose.msra.mxu1 %v487_v29  ;;  %765 = vmatpush.xpose.msra.mxu2 %v487_v29 }
  0x49   : > { %389 = vmatpush.msra.mxu0 %v362_v11  ;;  %754 = vmatpush.msra.mxu3 %v362_v11 }
  0x4b   : > { %390 = vmatpush.msra.mxu0 %v361_v12  ;;  %755 = vmatpush.msra.mxu3 %v361_v12 }
  0x4c   : > { %497 = vmatpush.xpose.msra.mxu1 %v486_v31  ;;  %767 = vmatpush.xpose.msra.mxu2 %v486_v31 }
  0x4d   : > { %391 = vmatpush.msra.mxu0 %v360_v13  ;;  %756 = vmatpush.msra.mxu3 %v360_v13 }
  0x4f   : > { %392 = vmatpush.msra.mxu0 %v359_v14  ;;  %757 = vmatpush.msra.mxu3 %v359_v14 }
  0x50   : > { %498 = vmatpush.xpose.msra.mxu1 %v485_v33  ;;  %769 = vmatpush.xpose.msra.mxu2 %v485_v33 }
  0x51   : > { %393 = vmatpush.msra.mxu0 %v358_v15  ;;  %758 = vmatpush.msra.mxu3 %v358_v15 }
  0x52   : > { %394 = vmatmul.f32.vlgmr.msra.gmra.mxu0 %v342_v16  ;;  %424 = vmatmul.f32.vlgmr.msra.gmra.mxu3 %v352_v19 }
  0x53   : > { %760 = vmatpush.xpose.msrb.mxu3 %v490_v23 }
  0x54   : > { %499 = vmatpush.xpose.msra.mxu1 %v484_v35  ;;  %771 = vmatpush.xpose.msra.mxu2 %v484_v35 }
  0x57   : > { %762 = vmatpush.xpose.msrb.mxu3 %v489_v25 }
  0x58   : > { %500 = vmatpush.xpose.msra.mxu1 %v483_v37  ;;  %773 = vmatpush.xpose.msra.mxu2 %v483_v37 }
  0x5a   : > { %397 = vmatmul.f32.gmra.mxu0 %v343_v17  ;;  %427 = vmatmul.f32.gmra.mxu3 %v353_v21  ;;  %v492_v17 = vstv %s491_s17 }
  0x5b   : > { %764 = vmatpush.xpose.msrb.mxu3 %v488_v27 }
  0x5c   : > { %501 = vmatpush.xpose.msra.mxu1 %v482_v39  ;;  %775 = vmatpush.xpose.msra.mxu2 %v482_v39 }
  0x5f   : > { %766 = vmatpush.xpose.msrb.mxu3 %v487_v29 }
  0x60   : > { %502 = vmatpush.xpose.msra.mxu1 %v481_v40  ;;  %777 = vmatpush.xpose.msra.mxu2 %v481_v40 }
  0x62   : > { %400 = vmatmul.f32.gmra.mxu0 %v344_v18  ;;  %430 = vmatmul.f32.gmra.mxu3 %v354_v24 }
  0x63   : > { %768 = vmatpush.xpose.msrb.mxu3 %v486_v31 }
  0x64   : > { %503 = vmatpush.xpose.msra.mxu1 %v480_v42  ;;  %779 = vmatpush.xpose.msra.mxu2 %v480_v42 }
  0x67   : > { %770 = vmatpush.xpose.msrb.mxu3 %v485_v33 }
  0x68   : > { %504 = vmatpush.xpose.msra.mxu1 %v479_v43  ;;  %781 = vmatpush.xpose.msra.mxu2 %v479_v43 }
  0x6a   : > { %403 = vmatmul.f32.gmra.mxu0 %v345_v20  ;;  %433 = vmatmul.f32.gmra.mxu3 %v355_v28 }
  0x6b   : > { %772 = vmatpush.xpose.msrb.mxu3 %v484_v35 }
  0x6c   : > { %505 = vmatpush.xpose.msra.mxu1 %v478_v44  ;;  %783 = vmatpush.xpose.msra.mxu2 %v478_v44 }
  0x6f   : > { %774 = vmatpush.xpose.msrb.mxu3 %v483_v37 }
  0x70   : > { %506 = vmatpush.xpose.msra.mxu1 %v477_v45  ;;  %785 = vmatpush.xpose.msra.mxu2 %v477_v45 }
  0x72   : > { %406 = vmatmul.f32.gmra.mxu0 %v346_v22  ;;  %436 = vmatmul.f32.gmra.mxu3 %v356_v32 }
  0x73   : > { %776 = vmatpush.xpose.msrb.mxu3 %v482_v39 }
  0x74   : > { %507 = vmatpush.xpose.msra.mxu1 %v476_v46  ;;  %787 = vmatpush.xpose.msra.mxu2 %v476_v46 }
  0x77   : > { %778 = vmatpush.xpose.msrb.mxu3 %v481_v40 }
  0x78   : > { %508 = vmatpush.xpose.msra.mxu1 %v475_v47  ;;  %789 = vmatpush.xpose.msra.mxu2 %v475_v47 }
  0x7a   : > { %409 = vmatmul.f32.gmra.mxu0 %v347_v26  ;;  %439 = vmatmul.f32.gmra.mxu3 %v357_v36 }
  0x7b   : > { %780 = vmatpush.xpose.msrb.mxu3 %v480_v42 }
  0x7f   : > { %782 = vmatpush.xpose.msrb.mxu3 %v479_v43 }
  0x82   : > { %412 = vmatmul.f32.gmra.mxu0 %v348_v30 }
  0x83   : > { %784 = vmatpush.xpose.msrb.mxu3 %v478_v44 }
  0x87   : > { %786 = vmatpush.xpose.msrb.mxu3 %v477_v45 }
  0x8a   : > { %415 = vmatmul.f32.gmra.mxu0 %v349_v34 }
  0x8b   : > { %788 = vmatpush.xpose.msrb.mxu3 %v476_v46 }
  0x8f   : > { %790 = vmatpush.xpose.msrb.mxu3 %v475_v47 }
  0x92   : > { %418 = vmatmul.f32.gmra.mxu0 %v350_v38 }
  0x9a   : > { %421 = vmatmul.f32.gmra.mxu0 %v351_v41 }
  0xcf   : > { %v395_v49 = vpop.f32.mrf.mxu0 }
  0xd0   : > { %v396_v50 = vadd.f32 %v873_v48, %v395_v49 }
  0xd2   : > { %509 = vmatmul.f32.vlgmr.msra.gmra.mxu1 %v396_v50 }
  0xd5   : > { %v425_v56 = vpop.f32.mrf.mxu3 }
  0xd6   : > { %v426_v14 = vadd.f32 %v873_v48, %v425_v56 }
  0xd7   : > { %v398_v51 = vpop.f32.mrf.mxu0 }
  0xd8   : > { %v399_v52 = vadd.f32 %v873_v48, %v398_v51 }
  0xda   : > { %512 = vmatmul.f32.gmra.mxu1 %v399_v52 }
  0xdd   : > { %v428_v59 = vpop.f32.mrf.mxu3 }
  0xde   : > { %v429_v15 = vadd.f32 %v873_v48, %v428_v59 }
  0xdf   : > { %v401_v53 = vpop.f32.mrf.mxu0 }
  0xe0   : > { %v402_v54 = vadd.f32 %v873_v48, %v401_v53 }
  0xe2   : > { %515 = vmatmul.f32.gmra.mxu1 %v402_v54 }
  0xe5   : > { %v431_v62 = vpop.f32.mrf.mxu3 }
  0xe6   : > { %v432_v16 = vadd.f32 %v873_v48, %v431_v62 }
  0xe7   : > { %v404_v55 = vpop.f32.mrf.mxu0 }
  0xe8   : > { %v405_v57 = vadd.f32 %v873_v48, %v404_v55 }
  0xea   : > { %518 = vmatmul.f32.gmra.mxu1 %v405_v57 }
  0xed   : > { %v434_v1 = vpop.f32.mrf.mxu3 }
  0xee   : > { %v435_v3 = vadd.f32 %v873_v48, %v434_v1 }
  0xef   : > { %v407_v58 = vpop.f32.mrf.mxu0 }
  0xf0   : > { %v408_v60 = vadd.f32 %v873_v48, %v407_v58  ;;  %548 = vmatmul.f32.vlgmr.msrb.gmra.mxu3 %v435_v3 }
  0xf2   : > { %521 = vmatmul.f32.gmra.mxu1 %v408_v60 }
  0xf5   : > { %v437_v5 = vpop.f32.mrf.mxu3 }
  0xf6   : > { %v438_v7 = vadd.f32 %v873_v48, %v437_v5 }
  0xf7   : > { %v410_v61 = vpop.f32.mrf.mxu0 }
  0xf8   : > { %v411_v63 = vadd.f32 %v873_v48, %v410_v61  ;;  %551 = vmatmul.f32.gmra.mxu3 %v438_v7 }
  0xfa   : > { %524 = vmatmul.f32.gmra.mxu1 %v411_v63 }
  0xfd   : > { %v440_v9 = vpop.f32.mrf.mxu3 }
  0xfe   : > { %v441_v11 = vadd.f32 %v873_v48, %v440_v9 }
  0xff   : > { %v413_v0 = vpop.f32.mrf.mxu0 }
 0x100   : > { %v414_v2 = vadd.f32 %v873_v48, %v413_v0  ;;  %554 = vmatmul.f32.gmra.mxu3 %v441_v11 }
 0x102   : > { %527 = vmatmul.f32.vlgmr.msra.gmra.mxu2 %v414_v2 }
 0x107   : > { %v416_v4 = vpop.f32.mrf.mxu0 }
 0x108   : > { %v417_v6 = vadd.f32 %v873_v48, %v416_v4 }
 0x10a   : > { %530 = vmatmul.f32.gmra.mxu2 %v417_v6 }
 0x10f   : > { %v419_v8 = vpop.f32.mrf.mxu0 }
 0x110   : > { %v420_v10 = vadd.f32 %v873_v48, %v419_v8 }
 0x112   : > { %533 = vmatmul.f32.gmra.mxu2 %v420_v10 }
 0x117   : > { %v422_v12 = vpop.f32.mrf.mxu0 }
 0x118   : > { %v423_v13 = vadd.f32 %v873_v48, %v422_v12 }
 0x11a   : > { %536 = vmatmul.f32.gmra.mxu2 %v423_v13 }
 0x122   : > { %539 = vmatmul.f32.gmra.mxu2 %v426_v14 }
 0x12a   : > { %542 = vmatmul.f32.gmra.mxu2 %v429_v15 }
 0x132   : > { %545 = vmatmul.f32.gmra.mxu2 %v432_v16 }
 0x14f   : > { %v510_v18 = vpop.f32.mrf.mxu1 }
 0x150   : > { %v511_v19 = vadd.f32 %v510_v18, %v492_v17 }
 0x152   : > { %558 = vst [vmem:[%s1263_s18] sm:$0xff] %v511_v19 }
 0x157   : > { %v513_v20 = vpop.f32.mrf.mxu1 }
 0x158   : > { %v514_v21 = vadd.f32 %v513_v20, %v492_v17 }
 0x15a   : > { %559 = vst [vmem:[%s1263_s18 + $0x8] sm:$0xff] %v514_v21 }
 0x15f   : > { %v516_v22 = vpop.f32.mrf.mxu1 }
 0x160   : > { %v517_v23 = vadd.f32 %v516_v22, %v492_v17 }
 0x162   : > { %560 = vst [vmem:[%s1263_s18 + $0x10] sm:$0xff] %v517_v23 }
 0x167   : > { %v519_v24 = vpop.f32.mrf.mxu1 }
 0x168   : > { %v520_v25 = vadd.f32 %v519_v24, %v492_v17 }
 0x16a   : > { %561 = vst [vmem:[%s1263_s18 + $0x18] sm:$0xff] %v520_v25 }
 0x16f   : > { %v522_v26 = vpop.f32.mrf.mxu1 }
 0x170   : > { %v523_v27 = vadd.f32 %v522_v26, %v492_v17 }
 0x172   : > { %562 = vst [vmem:[%s1263_s18 + $0x20] sm:$0xff] %v523_v27 }
 0x173   : > { %v549_v31 = vpop.f32.mrf.mxu3 }
 0x174   : > { %v550_v33 = vadd.f32 %v549_v31, %v492_v17 }
 0x176   : > { %571 = vst [vmem:[%s1263_s18 + $0x68] sm:$0xff] %v550_v33 }
 0x177   : > { %v525_v28 = vpop.f32.mrf.mxu1 }
 0x178   : > { %v526_v29 = vadd.f32 %v525_v28, %v492_v17 }
 0x17a   : > { %563 = vst [vmem:[%s1263_s18 + $0x28] sm:$0xff] %v526_v29 }
 0x17b   : > { %v552_v35 = vpop.f32.mrf.mxu3 }
 0x17c   : > { %v553_v37 = vadd.f32 %v552_v35, %v492_v17 }
 0x17e   : > { %572 = vst [vmem:[%s1263_s18 + $0x70] sm:$0xff] %v553_v37 }
 0x183   : > { %v555_v39 = vpop.f32.mrf.mxu3 }
 0x184   : > { %v556_v41 = vadd.f32 %v555_v39, %v492_v17 }
 0x185   : > { %v528_v30 = vpop.f32.mrf.mxu2 }
 0x186   : > { %v529_v32 = vadd.f32 %v528_v30, %v492_v17  ;;  %573 = vst [vmem:[%s1263_s18 + $0x78] sm:$0xff] %v556_v41 }
 0x188   : > { %564 = vst [vmem:[%s1263_s18 + $0x30] sm:$0xff] %v529_v32 }
 0x18d   : > { %v531_v34 = vpop.f32.mrf.mxu2 }
 0x18e   : > { %v532_v36 = vadd.f32 %v531_v34, %v492_v17 }
 0x190   : > { %565 = vst [vmem:[%s1263_s18 + $0x38] sm:$0xff] %v532_v36 }
 0x195   : > { %v534_v38 = vpop.f32.mrf.mxu2 }
 0x196   : > { %v535_v40 = vadd.f32 %v534_v38, %v492_v17 }
 0x198   : > { %566 = vst [vmem:[%s1263_s18 + $0x40] sm:$0xff] %v535_v40 }
 0x19d   : > { %v537_v42 = vpop.f32.mrf.mxu2 }
 0x19e   : > { %v538_v43 = vadd.f32 %v537_v42, %v492_v17 }
 0x1a0   : > { %567 = vst [vmem:[%s1263_s18 + $0x48] sm:$0xff] %v538_v43 }
 0x1a5   : > { %v540_v44 = vpop.f32.mrf.mxu2 }
 0x1a6   : > { %v541_v45 = vadd.f32 %v540_v44, %v492_v17 }
 0x1a8   : > { %568 = vst [vmem:[%s1263_s18 + $0x50] sm:$0xff] %v541_v45 }
 0x1ad   : > { %v543_v46 = vpop.f32.mrf.mxu2 }
 0x1ae   : > { %v544_v47 = vadd.f32 %v543_v46, %v492_v17 }
 0x1b0   : > { %569 = vst [vmem:[%s1263_s18 + $0x58] sm:$0xff] %v544_v47 }
 0x1b5   : > { %v546_v48 = vpop.f32.mrf.mxu2 }
 0x1b6   : > { %v547_v49 = vadd.f32 %v546_v48, %v492_v17 }
 0x1b8   : > { %570 = vst [vmem:[%s1263_s18 + $0x60] sm:$0xff] %v547_v49 }
 0x1b9   : > { %991 = shalt.err (!%p988_p0)
}
 0x1ba   : > { %s1059_s2 = smov 128   ;;  %s1060_s7 = smov 8  }
 0x1bb   : > { %799 = dma.vmem_to_hbm [thread:$0]  (%p1172_p5), %s591_s13, 2048, %s593_s29, %s575_s30, %s1059_s2, %s1059_s2, %s1060_s7  }
 0x1bc PF: > { %s607_s12 = sand.u32 1, %s1034_s20   ;;  %p813_p3 = pnand %p723_p11, %p1139_p6 }
 0x1bd   : > { %s608_s4 = scalar_lea.sflag [#allocation6], %s607_s12 }
 0x1be   : > { %p814_p7 = pneg %p813_p3 }
 0x1c0   : > { %1029 = dma.done.wait (%p814_p7), %s608_s4, 2048  }
 0x1c1   : > { %1031 = vsyncadd (%p814_p7), %s608_s4, 4294965248  ;;  %s25_s25 = sadd.s32 1, %s1054_s25   ;;  %s1344_s27 = sld [smem:[#allocation17_spill]] }
 0x1c2   : > { %p22_p9 = scmp.ge.s32.totalorder %s25_s25, 4   ;;  %s1345_s23 = sld [smem:[#allocation15_spill]] }
 0x1c3   : > { %s1346_s24 = sld [smem:[#allocation16_spill]]  ;;  %s1347_s20 = smov %s1038_s21 }
 0x1c4   : > { %s1348_s21 = smov %s1042_s22  ;;  %24 = sbr.rel (!%p22_p9) target bundleno = 11 (0xb), region = 106 }
 0x1c7   : > { %s1349_s22 = smov %s1344_s27 }
 0x1c9   :  { %614 = vsyncpa [#allocation5], 1 }
 0x1ca   :  { %616 = vsyncpa [#allocation5 + $0x1], 1 }
 0x1cb   :  { %617 = vsyncpa [#allocation8], 1 }
 0x1cc   :  { %619 = vsyncpa [#allocation8 + $0x1], 1 }
 0x1cd   :  { %620 = vsyncpa [#allocation6], 1 }
 0x1ce   :  { %622 = vsyncpa [#allocation6 + $0x1], 1 }

// kernel: tpu_custom_call.1
= control target key start
LH: loop header
LB: loop body
LE: loop exit
PB: predicated region body
PF: predicated region fallthrough
CT: control target
= control target key end

     0   :  { %s1320_s0 = inlined_call_operand.hbm [shape: f32[2,128,128], index: 0, kind: input, shape index: {}]   ;;  %s1321_s1 = inlined_call_operand.hbm [shape: f32[2,128,128], index: 1, kind: input, shape index: {}]   ;;  %s1322_s2 = inlined_call_operand.hbm [shape: f32[128,128], index: 2, kind: input, shape index: {}]   ;;  %s1323_s3 = inlined_call_operand.vmem [shape: f32[1,128], index: 3, kind: input, shape index: {}]   ;;  %s1324_s4 = inlined_call_operand.<no memory space> [shape: f32[1], index: 4, kind: input, shape index: {}]   ;;  %s1325_s5 = inlined_call_operand.hbm [shape: f32[2,128,128], index: 5, kind: output, shape index: {}]  }
   0x1   :  { %1332 = sst [smem:[#allocation18_spill]] %s1322_s2 }
   0x2   :  { %10 = sst [smem:[#allocation3]] %s1324_s4 }
   0x3   :  { %11 = vsyncpa [#allocation5], 0 }
   0x4   :  { %13 = vsyncpa [#allocation5 + $0x1], 0 }
   0x5   :  { %14 = vsyncpa [#allocation8], 0 }
   0x6   :  { %16 = vsyncpa [#allocation8 + $0x1], 0 }
   0x7   :  { %17 = vsyncpa [#allocation6], 0 }
   0x8   :  { %19 = vsyncpa [#allocation6 + $0x1], 0  ;;  %s1094_s20 = smov 0   ;;  %s1096_s21 = smov 0  }
   0x9   :  { %s1098_s22 = smov 0   ;;  %s1100_s23 = smov 0  }
   0xa   :  { %s1102_s24 = smov 0   ;;  %s1104_s25 = smov 0  }
   0xb LB: > { %1333 = sst [smem:[#allocation15_spill]] %s1050_s24  ;;  %s1125_s4 = sadd.s32 4294967295, %s1054_s25   ;;  %s1054_s25 = sphi %s1104_s25, %s25_s25   ;;  %s1050_s24 = sphi %s1102_s24, %s1346_s24   ;;  %s1046_s23 = sphi %s1100_s23, %s1345_s23   ;;  %s1042_s22 = sphi %s1098_s22, %s1349_s22   ;;  %s1038_s21 = sphi %s1096_s21, %s1348_s21   ;;  %s1034_s20 = sphi %s1094_s20, %s1347_s20  }
   0xc   : > { %s720_s26 = sadd.s32 4294967294, %s1054_s25   ;;  %p66_p0 = scmp.ne.s32.totalorder %s1038_s21, %s1034_s20 }
   0xd   : > { %p67_p1 = scmp.eq.s32.totalorder %s1125_s4, 0  ;;  %p185_p2 = scmp.eq.s32.totalorder %s1125_s4, 1 }
   0xe   : > { %p191_p3 = scmp.eq.s32.totalorder %s720_s26, 1  ;;  %p721_p5 = scmp.ge.s32.totalorder %s1054_s25, 1 }
   0xf   : > { %p1134_p4 = por %p67_p1, %p66_p0  ;;  %p198_p7 = scmp.lt.s32.totalorder %s1054_s25, 3 }
  0x10   : > { %p1139_p6 = por %p191_p3, %p66_p0  ;;  %s1336_s2 = sld [smem:[#allocation18_spill]] }
  0x11   : > { %p1147_p8 = pnand %p721_p5, %p198_p7  ;;  %s1056_s8 = smov [#allocation9]  }
  0x12   : > { %s211_s9 = sshll.u32 %s1056_s8, 4  ;;  %p723_p11 = scmp.ge.s32.totalorder %s1054_s25, 2  ;;  %s212_s9 = int_to_ptr.vmem [resolvable:$true] %s211_s9 }
  0x13   : > { %p801_p9 = pneg %p1147_p8  ;;  %s1326_s10 = smov 128  }
  0x14   : > { %s1328_s11 = smov 8   ;;  %s44_s12 = sadd.s32 1, %s1050_s24 }
  0x15   : > { %p802_p10 = pnand %p801_p9, %p67_p1  ;;  %p46_p12 = scmp.ge.s32.totalorder %s44_s12, 2 }
  0x16   : > { %s209_s6 = sshll.u32 %s1336_s2, 4  ;;  %s53_s13 = sadd.s32 1, %s1042_s22  ;;  %s210_s6 = int_to_ptr.hbm [resolvable:$true] %s209_s6 }
  0x17   : > { %804 = dma.hbm_to_vmem [thread:$0]  (!%p802_p10), %s210_s6, 2048, %s212_s9, [#allocation8], %s1326_s10, %s1326_s10, %s1328_s11  }
  0x18   : > { %p60_p13 = scmp.ne.s32.totalorder %s1042_s22, %s1038_s21  ;;  %p61_p0 = scmp.eq.s32.totalorder %s1054_s25, 0 }
  0x19   : > { %s1351_s12 = smov (%p46_p12, %s44_s12), 0  ;;  %p817_p7 = scmp.lt.s32.totalorder %s1054_s25, 2 }
  0x1a   : > { %1338 = sst [smem:[#allocation16_spill]] %s1351_s12  ;;  %p1166_p3 = por %p61_p0, %p60_p13 }
  0x1b   : > { %p1172_p5 = por %p185_p2, %p60_p13  ;;  %s48_s16 = ssub.s32 %s1050_s24, %s1351_s12 }
  0x1c   : > { %p51_p9 = scmp.eq.s32.totalorder %s48_s16, 0  ;;  %s231_s17 = sand.u32 1, %s1042_s22  }
  0x1d   : > { %s724_s18 = sshll.u32 %s231_s17, 7  ;;  %s740_s26 = sshll.u32 %s1050_s24, 7 }
  0x1e   : > { %s1181_s19 = scalar_select %p51_p9, %s1042_s22, %s53_s13  }
  0x1f   : > { %s242_s6 = scalar_lea.hbm %s1320_s0, %s740_s26  ;;  %s235_s8 = scalar_lea.vmem [#allocation4], %s724_s18 }
  0x20   : > { %1341 = sst [smem:[#allocation17_spill]] %s1181_s19  ;;  %s245_s9 = sshll.u32 %s235_s8, 4  ;;  %s246_s9 = int_to_ptr.vmem [resolvable:$true] %s245_s9 }
  0x21   : > { %s243_s10 = sshll.u32 %s242_s6, 4  ;;  %p806_p2 = pnand %p817_p7, %p1166_p3  ;;  %s244_s10 = int_to_ptr.hbm [resolvable:$true] %s243_s10 }
  0x22   : > { %s266_s16 = scalar_lea.hbm %s1321_s1, %s740_s26  ;;  %s232_s13 = scalar_lea.sflag [#allocation5], %s231_s17 }
  0x23   : > { %s267_s12 = sshll.u32 %s266_s16, 4  ;;  %s1342_s19 = smov 8   ;;  %s268_s12 = int_to_ptr.hbm [resolvable:$true] %s267_s12 }
  0x24   : > { %s1343_s24 = smov 128   ;;  %s259_s29 = scalar_lea.vmem [#allocation7], %s724_s18 }
  0x25   : > { %808 = dma.hbm_to_vmem [thread:$0]  (!%p806_p2), %s244_s10, 2048, %s246_s9, %s232_s13, %s1343_s24, %s1343_s24, %s1342_s19  }
  0x26   : > { %s269_s30 = sshll.u32 %s259_s29, 4  ;;  %s255_s8 = sand.u32 1, %s1054_s25   ;;  %s270_s30 = int_to_ptr.vmem [resolvable:$true] %s269_s30 }
  0x27   : > { %s256_s6 = scalar_lea.sflag [#allocation8], %s255_s8  ;;  %281 = sbr.rel (%p1147_p8) target bundleno = 444 (0x1bc), region = 40 }
  0x28   : > { %811 = dma.hbm_to_vmem [thread:$0]  (!%p806_p2), %s268_s12, 2048, %s270_s30, %s256_s6, %s1343_s24, %s1343_s24, %s1342_s19  }
  0x29   : > { %s1202_s2 = sand.u32 (!%p1147_p8), 1, %s1038_s21  }
  0x2a   : > { %s1205_s10 = sshll.u32 (!%p1147_p8), %s1202_s2, 7  ;;  %s284_s11 = scalar_lea.sflag (!%p1147_p8), [#allocation5], %s1202_s2 }
  0x2b   : > { %s1209_s14 = scalar_lea.vmem (!%p1147_p8), [#allocation4], %s1205_s10 }
  0x2c   : > { %1017 = dma.done.wait (%p1134_p4), %s284_s11, 2048  }
  0x2d   : > { %1019 = vsyncadd (%p1134_p4), %s284_s11, 4294965248  ;;  %s293_s24 = sand.u32 1, %s1125_s4   ;;  %s1217_s12 = scalar_lea.vmem [#allocation7], %s1205_s10 }
  0x2e   : > { %s294_s7 = scalar_lea.sflag [#allocation8], %s293_s24 }
  0x2f   : > { %1021 = dma.done.wait (%p1134_p4), %s294_s7, 2048  }
  0x30   : > { %1023 = vsyncadd (%p1134_p4), %s294_s7, 4294965248 }
  0x31   : > { %1025 = dma.done.wait (%p67_p1), [#allocation8], 2048  }
  0x32   : > { %1027 = vsyncadd (%p67_p1), [#allocation8], 4294965248  ;;  %v373_v0 = vld [vmem:[#allocation9 + $0x78] sm:$0xff]  ;;  %v372_v1 = vld [vmem:[#allocation9 + $0x70] sm:$0xff]  ;;  %s491_s17 = sld [smem:[#allocation3]]  ;;  %s1263_s18 = scalar_lea.vmem [#allocation10], %s1205_s10 }
  0x33   : > { %378 = vmatpush.msra.mxu0 %v373_v0  ;;  %743 = vmatpush.msra.mxu3 %v373_v0  ;;  %v371_v2 = vld [vmem:[#allocation9 + $0x68] sm:$0xff]  ;;  %v370_v3 = vld [vmem:[#allocation9 + $0x60] sm:$0xff]  ;;  %v369_v4 = vld [vmem:[#allocation9 + $0x58] sm:$0xff]  ;;  %s742_s19 = sshll.u32 %s1046_s23, 7  ;;  %s590_s13 = sshll.u32 %s1263_s18, 4  ;;  %s591_s13 = int_to_ptr.vmem [resolvable:$true] %s590_s13 }
  0x34   : > { %v368_v5 = vld [vmem:[#allocation9 + $0x50] sm:$0xff]  ;;  %v367_v6 = vld [vmem:[#allocation9 + $0x48] sm:$0xff]  ;;  %v366_v7 = vld [vmem:[#allocation9 + $0x40] sm:$0xff]  ;;  %s589_s16 = scalar_lea.hbm %s1325_s5, %s742_s19  ;;  %s575_s30 = scalar_lea.sflag [#allocation6], %s1202_s2 }
  0x35   : > { %379 = vmatpush.msra.mxu0 %v372_v1  ;;  %744 = vmatpush.msra.mxu3 %v372_v1  ;;  %v365_v8 = vld [vmem:[#allocation9 + $0x38] sm:$0xff]  ;;  %v364_v9 = vld [vmem:[#allocation9 + $0x30] sm:$0xff]  ;;  %v363_v10 = vld [vmem:[#allocation9 + $0x28] sm:$0xff]  ;;  %s592_s29 = sshll.u32 %s589_s16, 4  ;;  %s984_s11 = scalar_lea.hbm %s1325_s5, 256  ;;  %s593_s29 = int_to_ptr.hbm [resolvable:$true] %s592_s29 }
  0x36   : > { %v362_v11 = vld [vmem:[#allocation9 + $0x20] sm:$0xff]  ;;  %v361_v12 = vld [vmem:[#allocation9 + $0x18] sm:$0xff]  ;;  %v360_v13 = vld [vmem:[#allocation9 + $0x10] sm:$0xff]  ;;  %s978_s8 = sshra.s32 %s593_s29, 4  ;;  %s979_s8 = int_to_ptr.hbm [resolvable:$true] %s978_s8 }
  0x37   : > { %380 = vmatpush.msra.mxu0 %v371_v2  ;;  %745 = vmatpush.msra.mxu3 %v371_v2  ;;  %v359_v14 = vld [vmem:[#allocation9 + $0x8] sm:$0xff]  ;;  %v358_v15 = vld [vmem:[#allocation9] sm:$0xff]  ;;  %v344_v18 = vld [vmem:[%s1209_s14 + $0x10] sm:$0xff]  ;;  %s980_s6 = scalar_lea.hbm %s979_s8, 128  ;;  %p985_p10 = scmp.lt.s32.totalorder %s979_s8, %s1325_s5 }
  0x38   : > { %v342_v16 = vld [vmem:[%s1209_s14] sm:$0xff]  ;;  %v343_v17 = vld [vmem:[%s1209_s14 + $0x8] sm:$0xff]  ;;  %v352_v19 = vld [vmem:[%s1209_s14 + $0x50] sm:$0xff]  ;;  %p981_p1 = scmp.ne.s32.totalorder %s979_s8, %s980_s6  ;;  %p986_p12 = scmp.lt.s32.totalorder %s984_s11, %s980_s6 }
  0x39   : > { %381 = vmatpush.msra.mxu0 %v370_v3  ;;  %746 = vmatpush.msra.mxu3 %v370_v3  ;;  %v345_v20 = vld [vmem:[%s1209_s14 + $0x18] sm:$0xff]  ;;  %v346_v22 = vld [vmem:[%s1209_s14 + $0x20] sm:$0xff]  ;;  %v489_v25 = vld [vmem:[%s1217_s12 + $0x70] sm:$0xff] }
  0x3a   : > { %v353_v21 = vld [vmem:[%s1209_s14 + $0x58] sm:$0xff]  ;;  %v354_v24 = vld [vmem:[%s1209_s14 + $0x60] sm:$0xff]  ;;  %v347_v26 = vld [vmem:[%s1209_s14 + $0x28] sm:$0xff]  ;;  %p982_p4 = pnand %p981_p1, %p1172_p5  ;;  %p987_p13 = por %p986_p12, %p985_p10 }
  0x3b   : > { %382 = vmatpush.msra.mxu0 %v369_v4  ;;  %747 = vmatpush.msra.mxu3 %v369_v4  ;;  %v490_v23 = vld [vmem:[%s1217_s12 + $0x78] sm:$0xff]  ;;  %v488_v27 = vld [vmem:[%s1217_s12 + $0x68] sm:$0xff]  ;;  %v487_v29 = vld [vmem:[%s1217_s12 + $0x60] sm:$0xff] }
  0x3c   : > { %493 = vmatpush.xpose.msra.mxu1 %v490_v23  ;;  %759 = vmatpush.xpose.msra.mxu2 %v490_v23  ;;  %v355_v28 = vld [vmem:[%s1209_s14 + $0x68] sm:$0xff]  ;;  %v348_v30 = vld [vmem:[%s1209_s14 + $0x30] sm:$0xff]  ;;  %v486_v31 = vld [vmem:[%s1217_s12 + $0x58] sm:$0xff]  ;;  %p983_p8 = pneg %p982_p4 }
  0x3d   : > { %383 = vmatpush.msra.mxu0 %v368_v5  ;;  %748 = vmatpush.msra.mxu3 %v368_v5  ;;  %v356_v32 = vld [vmem:[%s1209_s14 + $0x70] sm:$0xff]  ;;  %v349_v34 = vld [vmem:[%s1209_s14 + $0x38] sm:$0xff]  ;;  %v484_v35 = vld [vmem:[%s1217_s12 + $0x48] sm:$0xff] }
  0x3e   : > { %v485_v33 = vld [vmem:[%s1217_s12 + $0x50] sm:$0xff]  ;;  %v357_v36 = vld [vmem:[%s1209_s14 + $0x78] sm:$0xff]  ;;  %v483_v37 = vld [vmem:[%s1217_s12 + $0x40] sm:$0xff]  ;;  %p988_p0 = pnand %p987_p13, %p983_p8 }
  0x3f   : > { %384 = vmatpush.msra.mxu0 %v367_v6  ;;  %749 = vmatpush.msra.mxu3 %v367_v6  ;;  %v350_v38 = vld [vmem:[%s1209_s14 + $0x40] sm:$0xff]  ;;  %v482_v39 = vld [vmem:[%s1217_s12 + $0x38] sm:$0xff]  ;;  %v481_v40 = vld [vmem:[%s1217_s12 + $0x30] sm:$0xff] }
  0x40   : > { %494 = vmatpush.xpose.msra.mxu1 %v489_v25  ;;  %761 = vmatpush.xpose.msra.mxu2 %v489_v25  ;;  %v351_v41 = vld [vmem:[%s1209_s14 + $0x48] sm:$0xff]  ;;  %v479_v43 = vld [vmem:[%s1217_s12 + $0x20] sm:$0xff]  ;;  %v478_v44 = vld [vmem:[%s1217_s12 + $0x18] sm:$0xff] }
  0x41   : > { %385 = vmatpush.msra.mxu0 %v366_v7  ;;  %750 = vmatpush.msra.mxu3 %v366_v7  ;;  %v480_v42 = vld [vmem:[%s1217_s12 + $0x28] sm:$0xff]  ;;  %v477_v45 = vld [vmem:[%s1217_s12 + $0x10] sm:$0xff]  ;;  %v475_v47 = vld [vmem:[%s1217_s12] sm:$0xff] }
  0x42   : > { %v476_v46 = vld [vmem:[%s1217_s12 + $0x8] sm:$0xff]  ;;  %v873_v48 = vld [vmem:[%s1323_s3] ss:$0 sm:$0xff] }
  0x43   : > { %386 = vmatpush.msra.mxu0 %v365_v8  ;;  %751 = vmatpush.msra.mxu3 %v365_v8 }
  0x44   : > { %495 = vmatpush.xpose.msra.mxu1 %v488_v27  ;;  %763 = vmatpush.xpose.msra.mxu2 %v488_v27 }
  0x45   : > { %387 = vmatpush.msra.mxu0 %v364_v9  ;;  %752 = vmatpush.msra.mxu3 %v364_v9 }
  0x47   : > { %388 = vmatpush.msra.mxu0 %v363_v10  ;;  %753 = vmatpush.msra.mxu3 %v363_v10 }
  0x48   : > { %496 = vmatpush.xpose.msra.mxu1 %v487_v29  ;;  %765 = vmatpush.xpose.msra.mxu2 %v487_v29 }
  0x49   : > { %389 = vmatpush.msra.mxu0 %v362_v11  ;;  %754 = vmatpush.msra.mxu3 %v362_v11 }
  0x4b   : > { %390 = vmatpush.msra.mxu0 %v361_v12  ;;  %755 = vmatpush.msra.mxu3 %v361_v12 }
  0x4c   : > { %497 = vmatpush.xpose.msra.mxu1 %v486_v31  ;;  %767 = vmatpush.xpose.msra.mxu2 %v486_v31 }
  0x4d   : > { %391 = vmatpush.msra.mxu0 %v360_v13  ;;  %756 = vmatpush.msra.mxu3 %v360_v13 }
  0x4f   : > { %392 = vmatpush.msra.mxu0 %v359_v14  ;;  %757 = vmatpush.msra.mxu3 %v359_v14 }
  0x50   : > { %498 = vmatpush.xpose.msra.mxu1 %v485_v33  ;;  %769 = vmatpush.xpose.msra.mxu2 %v485_v33 }
  0x51   : > { %393 = vmatpush.msra.mxu0 %v358_v15  ;;  %758 = vmatpush.msra.mxu3 %v358_v15 }
  0x52   : > { %394 = vmatmul.f32.vlgmr.msra.gmra.mxu0 %v342_v16  ;;  %424 = vmatmul.f32.vlgmr.msra.gmra.mxu3 %v352_v19 }
  0x53   : > { %760 = vmatpush.xpose.msrb.mxu3 %v490_v23 }
  0x54   : > { %499 = vmatpush.xpose.msra.mxu1 %v484_v35  ;;  %771 = vmatpush.xpose.msra.mxu2 %v484_v35 }
  0x57   : > { %762 = vmatpush.xpose.msrb.mxu3 %v489_v25 }
  0x58   : > { %500 = vmatpush.xpose.msra.mxu1 %v483_v37  ;;  %773 = vmatpush.xpose.msra.mxu2 %v483_v37 }
  0x5a   : > { %397 = vmatmul.f32.gmra.mxu0 %v343_v17  ;;  %427 = vmatmul.f32.gmra.mxu3 %v353_v21  ;;  %v492_v17 = vstv %s491_s17 }
  0x5b   : > { %764 = vmatpush.xpose.msrb.mxu3 %v488_v27 }
  0x5c   : > { %501 = vmatpush.xpose.msra.mxu1 %v482_v39  ;;  %775 = vmatpush.xpose.msra.mxu2 %v482_v39 }
  0x5f   : > { %766 = vmatpush.xpose.msrb.mxu3 %v487_v29 }
  0x60   : > { %502 = vmatpush.xpose.msra.mxu1 %v481_v40  ;;  %777 = vmatpush.xpose.msra.mxu2 %v481_v40 }
  0x62   : > { %400 = vmatmul.f32.gmra.mxu0 %v344_v18  ;;  %430 = vmatmul.f32.gmra.mxu3 %v354_v24 }
  0x63   : > { %768 = vmatpush.xpose.msrb.mxu3 %v486_v31 }
  0x64   : > { %503 = vmatpush.xpose.msra.mxu1 %v480_v42  ;;  %779 = vmatpush.xpose.msra.mxu2 %v480_v42 }
  0x67   : > { %770 = vmatpush.xpose.msrb.mxu3 %v485_v33 }
  0x68   : > { %504 = vmatpush.xpose.msra.mxu1 %v479_v43  ;;  %781 = vmatpush.xpose.msra.mxu2 %v479_v43 }
  0x6a   : > { %403 = vmatmul.f32.gmra.mxu0 %v345_v20  ;;  %433 = vmatmul.f32.gmra.mxu3 %v355_v28 }
  0x6b   : > { %772 = vmatpush.xpose.msrb.mxu3 %v484_v35 }
  0x6c   : > { %505 = vmatpush.xpose.msra.mxu1 %v478_v44  ;;  %783 = vmatpush.xpose.msra.mxu2 %v478_v44 }
  0x6f   : > { %774 = vmatpush.xpose.msrb.mxu3 %v483_v37 }
  0x70   : > { %506 = vmatpush.xpose.msra.mxu1 %v477_v45  ;;  %785 = vmatpush.xpose.msra.mxu2 %v477_v45 }
  0x72   : > { %406 = vmatmul.f32.gmra.mxu0 %v346_v22  ;;  %436 = vmatmul.f32.gmra.mxu3 %v356_v32 }
  0x73   : > { %776 = vmatpush.xpose.msrb.mxu3 %v482_v39 }
  0x74   : > { %507 = vmatpush.xpose.msra.mxu1 %v476_v46  ;;  %787 = vmatpush.xpose.msra.mxu2 %v476_v46 }
  0x77   : > { %778 = vmatpush.xpose.msrb.mxu3 %v481_v40 }
  0x78   : > { %508 = vmatpush.xpose.msra.mxu1 %v475_v47  ;;  %789 = vmatpush.xpose.msra.mxu2 %v475_v47 }
  0x7a   : > { %409 = vmatmul.f32.gmra.mxu0 %v347_v26  ;;  %439 = vmatmul.f32.gmra.mxu3 %v357_v36 }
  0x7b   : > { %780 = vmatpush.xpose.msrb.mxu3 %v480_v42 }
  0x7f   : > { %782 = vmatpush.xpose.msrb.mxu3 %v479_v43 }
  0x82   : > { %412 = vmatmul.f32.gmra.mxu0 %v348_v30 }
  0x83   : > { %784 = vmatpush.xpose.msrb.mxu3 %v478_v44 }
  0x87   : > { %786 = vmatpush.xpose.msrb.mxu3 %v477_v45 }
  0x8a   : > { %415 = vmatmul.f32.gmra.mxu0 %v349_v34 }
  0x8b   : > { %788 = vmatpush.xpose.msrb.mxu3 %v476_v46 }
  0x8f   : > { %790 = vmatpush.xpose.msrb.mxu3 %v475_v47 }
  0x92   : > { %418 = vmatmul.f32.gmra.mxu0 %v350_v38 }
  0x9a   : > { %421 = vmatmul.f32.gmra.mxu0 %v351_v41 }
  0xcf   : > { %v395_v49 = vpop.f32.mrf.mxu0 }
  0xd0   : > { %v396_v50 = vadd.f32 %v873_v48, %v395_v49 }
  0xd2   : > { %509 = vmatmul.f32.vlgmr.msra.gmra.mxu1 %v396_v50 }
  0xd5   : > { %v425_v56 = vpop.f32.mrf.mxu3 }
  0xd6   : > { %v426_v14 = vadd.f32 %v873_v48, %v425_v56 }
  0xd7   : > { %v398_v51 = vpop.f32.mrf.mxu0 }
  0xd8   : > { %v399_v52 = vadd.f32 %v873_v48, %v398_v51 }
  0xda   : > { %512 = vmatmul.f32.gmra.mxu1 %v399_v52 }
  0xdd   : > { %v428_v59 = vpop.f32.mrf.mxu3 }
  0xde   : > { %v429_v15 = vadd.f32 %v873_v48, %v428_v59 }
  0xdf   : > { %v401_v53 = vpop.f32.mrf.mxu0 }
  0xe0   : > { %v402_v54 = vadd.f32 %v873_v48, %v401_v53 }
  0xe2   : > { %515 = vmatmul.f32.gmra.mxu1 %v402_v54 }
  0xe5   : > { %v431_v62 = vpop.f32.mrf.mxu3 }
  0xe6   : > { %v432_v16 = vadd.f32 %v873_v48, %v431_v62 }
  0xe7   : > { %v404_v55 = vpop.f32.mrf.mxu0 }
  0xe8   : > { %v405_v57 = vadd.f32 %v873_v48, %v404_v55 }
  0xea   : > { %518 = vmatmul.f32.gmra.mxu1 %v405_v57 }
  0xed   : > { %v434_v1 = vpop.f32.mrf.mxu3 }
  0xee   : > { %v435_v3 = vadd.f32 %v873_v48, %v434_v1 }
  0xef   : > { %v407_v58 = vpop.f32.mrf.mxu0 }
  0xf0   : > { %v408_v60 = vadd.f32 %v873_v48, %v407_v58  ;;  %548 = vmatmul.f32.vlgmr.msrb.gmra.mxu3 %v435_v3 }
  0xf2   : > { %521 = vmatmul.f32.gmra.mxu1 %v408_v60 }
  0xf5   : > { %v437_v5 = vpop.f32.mrf.mxu3 }
  0xf6   : > { %v438_v7 = vadd.f32 %v873_v48, %v437_v5 }
  0xf7   : > { %v410_v61 = vpop.f32.mrf.mxu0 }
  0xf8   : > { %v411_v63 = vadd.f32 %v873_v48, %v410_v61  ;;  %551 = vmatmul.f32.gmra.mxu3 %v438_v7 }
  0xfa   : > { %524 = vmatmul.f32.gmra.mxu1 %v411_v63 }
  0xfd   : > { %v440_v9 = vpop.f32.mrf.mxu3 }
  0xfe   : > { %v441_v11 = vadd.f32 %v873_v48, %v440_v9 }
  0xff   : > { %v413_v0 = vpop.f32.mrf.mxu0 }
 0x100   : > { %v414_v2 = vadd.f32 %v873_v48, %v413_v0  ;;  %554 = vmatmul.f32.gmra.mxu3 %v441_v11 }
 0x102   : > { %527 = vmatmul.f32.vlgmr.msra.gmra.mxu2 %v414_v2 }
 0x107   : > { %v416_v4 = vpop.f32.mrf.mxu0 }
 0x108   : > { %v417_v6 = vadd.f32 %v873_v48, %v416_v4 }
 0x10a   : > { %530 = vmatmul.f32.gmra.mxu2 %v417_v6 }
 0x10f   : > { %v419_v8 = vpop.f32.mrf.mxu0 }
 0x110   : > { %v420_v10 = vadd.f32 %v873_v48, %v419_v8 }
 0x112   : > { %533 = vmatmul.f32.gmra.mxu2 %v420_v10 }
 0x117   : > { %v422_v12 = vpop.f32.mrf.mxu0 }
 0x118   : > { %v423_v13 = vadd.f32 %v873_v48, %v422_v12 }
 0x11a   : > { %536 = vmatmul.f32.gmra.mxu2 %v423_v13 }
 0x122   : > { %539 = vmatmul.f32.gmra.mxu2 %v426_v14 }
 0x12a   : > { %542 = vmatmul.f32.gmra.mxu2 %v429_v15 }
 0x132   : > { %545 = vmatmul.f32.gmra.mxu2 %v432_v16 }
 0x14f   : > { %v510_v18 = vpop.f32.mrf.mxu1 }
 0x150   : > { %v511_v19 = vadd.f32 %v510_v18, %v492_v17 }
 0x152   : > { %558 = vst [vmem:[%s1263_s18] sm:$0xff] %v511_v19 }
 0x157   : > { %v513_v20 = vpop.f32.mrf.mxu1 }
 0x158   : > { %v514_v21 = vadd.f32 %v513_v20, %v492_v17 }
 0x15a   : > { %559 = vst [vmem:[%s1263_s18 + $0x8] sm:$0xff] %v514_v21 }
 0x15f   : > { %v516_v22 = vpop.f32.mrf.mxu1 }
 0x160   : > { %v517_v23 = vadd.f32 %v516_v22, %v492_v17 }
 0x162   : > { %560 = vst [vmem:[%s1263_s18 + $0x10] sm:$0xff] %v517_v23 }
 0x167   : > { %v519_v24 = vpop.f32.mrf.mxu1 }
 0x168   : > { %v520_v25 = vadd.f32 %v519_v24, %v492_v17 }
 0x16a   : > { %561 = vst [vmem:[%s1263_s18 + $0x18] sm:$0xff] %v520_v25 }
 0x16f   : > { %v522_v26 = vpop.f32.mrf.mxu1 }
 0x170   : > { %v523_v27 = vadd.f32 %v522_v26, %v492_v17 }
 0x172   : > { %562 = vst [vmem:[%s1263_s18 + $0x20] sm:$0xff] %v523_v27 }
 0x173   : > { %v549_v31 = vpop.f32.mrf.mxu3 }
 0x174   : > { %v550_v33 = vadd.f32 %v549_v31, %v492_v17 }
 0x176   : > { %571 = vst [vmem:[%s1263_s18 + $0x68] sm:$0xff] %v550_v33 }
 0x177   : > { %v525_v28 = vpop.f32.mrf.mxu1 }
 0x178   : > { %v526_v29 = vadd.f32 %v525_v28, %v492_v17 }
 0x17a   : > { %563 = vst [vmem:[%s1263_s18 + $0x28] sm:$0xff] %v526_v29 }
 0x17b   : > { %v552_v35 = vpop.f32.mrf.mxu3 }
 0x17c   : > { %v553_v37 = vadd.f32 %v552_v35, %v492_v17 }
 0x17e   : > { %572 = vst [vmem:[%s1263_s18 + $0x70] sm:$0xff] %v553_v37 }
 0x183   : > { %v555_v39 = vpop.f32.mrf.mxu3 }
 0x184   : > { %v556_v41 = vadd.f32 %v555_v39, %v492_v17 }
 0x185   : > { %v528_v30 = vpop.f32.mrf.mxu2 }
 0x186   : > { %v529_v32 = vadd.f32 %v528_v30, %v492_v17  ;;  %573 = vst [vmem:[%s1263_s18 + $0x78] sm:$0xff] %v556_v41 }
 0x188   : > { %564 = vst [vmem:[%s1263_s18 + $0x30] sm:$0xff] %v529_v32 }
 0x18d   : > { %v531_v34 = vpop.f32.mrf.mxu2 }
 0x18e   : > { %v532_v36 = vadd.f32 %v531_v34, %v492_v17 }
 0x190   : > { %565 = vst [vmem:[%s1263_s18 + $0x38] sm:$0xff] %v532_v36 }
 0x195   : > { %v534_v38 = vpop.f32.mrf.mxu2 }
 0x196   : > { %v535_v40 = vadd.f32 %v534_v38, %v492_v17 }
 0x198   : > { %566 = vst [vmem:[%s1263_s18 + $0x40] sm:$0xff] %v535_v40 }
 0x19d   : > { %v537_v42 = vpop.f32.mrf.mxu2 }
 0x19e   : > { %v538_v43 = vadd.f32 %v537_v42, %v492_v17 }
 0x1a0   : > { %567 = vst [vmem:[%s1263_s18 + $0x48] sm:$0xff] %v538_v43 }
 0x1a5   : > { %v540_v44 = vpop.f32.mrf.mxu2 }
 0x1a6   : > { %v541_v45 = vadd.f32 %v540_v44, %v492_v17 }
 0x1a8   : > { %568 = vst [vmem:[%s1263_s18 + $0x50] sm:$0xff] %v541_v45 }
 0x1ad   : > { %v543_v46 = vpop.f32.mrf.mxu2 }
 0x1ae   : > { %v544_v47 = vadd.f32 %v543_v46, %v492_v17 }
 0x1b0   : > { %569 = vst [vmem:[%s1263_s18 + $0x58] sm:$0xff] %v544_v47 }
 0x1b5   : > { %v546_v48 = vpop.f32.mrf.mxu2 }
 0x1b6   : > { %v547_v49 = vadd.f32 %v546_v48, %v492_v17 }
 0x1b8   : > { %570 = vst [vmem:[%s1263_s18 + $0x60] sm:$0xff] %v547_v49 }
 0x1b9   : > { %991 = shalt.err (!%p988_p0)
}
 0x1ba   : > { %s1059_s2 = smov 128   ;;  %s1060_s7 = smov 8  }
 0x1bb   : > { %799 = dma.vmem_to_hbm [thread:$0]  (%p1172_p5), %s591_s13, 2048, %s593_s29, %s575_s30, %s1059_s2, %s1059_s2, %s1060_s7  }
 0x1bc PF: > { %s607_s12 = sand.u32 1, %s1034_s20   ;;  %p813_p3 = pnand %p723_p11, %p1139_p6 }
 0x1bd   : > { %s608_s4 = scalar_lea.sflag [#allocation6], %s607_s12 }
 0x1be   : > { %p814_p7 = pneg %p813_p3 }
 0x1c0   : > { %1029 = dma.done.wait (%p814_p7), %s608_s4, 2048  }
 0x1c1   : > { %1031 = vsyncadd (%p814_p7), %s608_s4, 4294965248  ;;  %s25_s25 = sadd.s32 1, %s1054_s25   ;;  %s1344_s27 = sld [smem:[#allocation17_spill]] }
 0x1c2   : > { %p22_p9 = scmp.ge.s32.totalorder %s25_s25, 4   ;;  %s1345_s23 = sld [smem:[#allocation15_spill]] }
 0x1c3   : > { %s1346_s24 = sld [smem:[#allocation16_spill]]  ;;  %s1347_s20 = smov %s1038_s21 }
 0x1c4   : > { %s1348_s21 = smov %s1042_s22  ;;  %24 = sbr.rel (!%p22_p9) target bundleno = 11 (0xb), region = 106 }
 0x1c7   : > { %s1349_s22 = smov %s1344_s27 }
 0x1c9   :  { %614 = vsyncpa [#allocation5], 1 }
 0x1ca   :  { %616 = vsyncpa [#allocation5 + $0x1], 1 }
 0x1cb   :  { %617 = vsyncpa [#allocation8], 1 }
 0x1cc   :  { %619 = vsyncpa [#allocation8 + $0x1], 1 }
 0x1cd   :  { %620 = vsyncpa [#allocation6], 1 }
 0x1ce   :  { %622 = vsyncpa [#allocation6 + $0x1], 1 }

</bundles_post_ra>
